<compile_context>
chip_gen: v7x
topology: tpu7x:2x2x1
jax: 0.10.0
libtpu: 0.0.40
codegen_flags: <defaults>
</compile_context>

<pallas_src>
import jax
import jax.numpy as jnp
from jax import lax
from jax.experimental import pallas as pl
from jax.experimental.pallas import tpu as pltpu


def _plan_tiles(B, C, S, itemsize, target_bytes=4 * 1024 * 1024,
                min_parallel_steps=8, max_ts=8192):
    """Pick (ts, tc, CC): spatial tile, channel chunk, accumulator rows."""
    cc_base = max(8, 32 // max(1, itemsize))  # sublane packing per vreg

    # 1) Spatial tile: wide, lane-dense (multiple of 128 unless S < 128).
    if S <= 128:
        ts = S
    else:
        ts = max(128, min((S // 128) * 128, max_ts))
        # Make sure the parallel grid has enough steps (megacore sharding on
        # v7x, pipeline depth everywhere); cap ts when B is small.
        while ts > 128 and B * (-(-S // ts)) < min_parallel_steps:
            ts = max(128, ((ts // 2) // 128) * 128)

    # 2) Channel chunk within the per-block byte budget.
    tc_max = max(1, target_bytes // max(1, ts * itemsize))
    if tc_max >= C:
        tc = C  # whole channel extent in one block -> single reduction step
    else:
        tc = min(C, max(cc_base, (tc_max // cc_base) * cc_base))

    CC = min(cc_base, tc)
    return ts, tc, CC


def _make_kernel(C, tc, ts, CC, n_k):
    """Build the kernel, specialized at trace time on the tiling plan."""
    inv_c = float(1.0 / C)            # folded -> single multiply, no divide
    n_full = tc // CC                 # full CC-row sub-chunks per block
    rem = tc - n_full * CC            # tail rows (only possible when tc == C)
    needs_mask = (n_k > 1) and (C % tc != 0)   # ragged last channel block
    use_fori = n_full > 8             # bound live ranges for large C

    def kernel(x_ref, o_ref, acc_ref):
        # x_ref: (tc, ts) block; o_ref: (1, ts) block; acc_ref: (CC, ts) f32.
        k = pl.program_id(2)

        if n_k == 1:
            acc = jnp.zeros((CC, ts), jnp.float32)
        else:
            @pl.when(k == 0)
            def _init():
                acc_ref[...] = jnp.zeros_like(acc_ref)
            acc = acc_ref[...]

        def masked(rows, c0):
            if not needs_mask:
                return rows
            gidx = k * tc + c0 + lax.broadcasted_iota(jnp.int32, rows.shape, 0)
            return jnp.where(gidx < C, rows, 0.0)

        # Full-vreg elementwise accumulation over channel sub-chunks.
        if use_fori:
            def body(i, a):
                c0 = pl.multiple_of(i * CC, CC)
                rows = x_ref[pl.ds(c0, CC), :].astype(jnp.float32)
                return a + masked(rows, c0)
            acc = lax.fori_loop(0, n_full, body, acc, unroll=4)
        else:
            for i in range(n_full):
                rows = x_ref[i * CC:(i + 1) * CC, :].astype(jnp.float32)
                acc = acc + masked(rows, i * CC)

        if n_k == 1:
            # Single cross-sublane reduce at the end; fold the tail (if any)
            # straight into the (1, ts) total.
            total = jnp.sum(acc, axis=0, keepdims=True)
            if rem:
                tail = x_ref[n_full * CC:tc, :].astype(jnp.float32)
                total = total + jnp.sum(tail, axis=0, keepdims=True)
            o_ref[...] = (total * inv_c).astype(o_ref.dtype)
        else:
            acc_ref[...] = acc

            @pl.when(k == n_k - 1)
            def _finalize():
                total = jnp.sum(acc, axis=0, keepdims=True)
                o_ref[...] = (total * inv_c).astype(o_ref.dtype)

    return kernel


def channel_avg_pool(x):
    """Mean over the channel dim of an NCHW tensor, returned as (B, 1, H, W)."""
    B, C, H, W = x.shape
    S = H * W
    itemsize = jnp.dtype(x.dtype).itemsize

    x2 = x.reshape(B, C, S)  # free view for contiguous NCHW

    ts, tc, CC = _plan_tiles(B, C, S, itemsize)
    n_s = pl.cdiv(S, ts)
    n_k = pl.cdiv(C, tc)
    grid = (B, n_s, n_k)

    kernel = _make_kernel(C, tc, ts, CC, n_k)

    # Explicit scoped-VMEM limit: 2x double-buffered input block + output
    # blocks + f32 accumulator scratch, with headroom (keeps v5e's 16 MiB
    # scoped default from being the binding constraint while staying well
    # under v7x's 64 MiB physical VMEM).
    need = 2 * tc * ts * itemsize + 2 * ts * itemsize + CC * ts * 4
    vmem_limit = int(min(32 * 1024 * 1024,
                         max(16 * 1024 * 1024, need + 2 * 1024 * 1024)))

    out = pl.pallas_call(
        kernel,
        out_shape=jax.ShapeDtypeStruct((B, 1, S), x.dtype),
        grid_spec=pltpu.PrefetchScalarGridSpec(
            num_scalar_prefetch=0,
            grid=grid,
            in_specs=[
                pl.BlockSpec((pl.Squeezed(), tc, ts), lambda b, s, k: (b, k, s)),
            ],
            out_specs=pl.BlockSpec((pl.Squeezed(), 1, ts), lambda b, s, k: (b, 0, s)),
            scratch_shapes=[pltpu.VMEM((CC, ts), jnp.float32)],
        ),
        compiler_params=pltpu.CompilerParams(
            dimension_semantics=("parallel", "parallel", "arbitrary"),
            vmem_limit_bytes=vmem_limit,
        ),
        cost_estimate=pl.CostEstimate(
            flops=B * C * S,
            transcendentals=0,
            bytes_accessed=(B * C * S + B * S) * itemsize,
        ),
    )(x2)

    return out.reshape(B, 1, H, W)


if __name__ == "__main__":
    key = jax.random.PRNGKey(0)
    B, C, H, W = 2, 4, 16, 16
    x = jax.random.normal(key, (B, C, H, W), dtype=jnp.float32)

    out = channel_avg_pool(x)
    out = jax.block_until_ready(out)

    # Reference (same semantics as torch.mean(x, dim=1).reshape(B, 1, H, W)).
    ref = jnp.mean(x, axis=1).reshape(B, 1, H, W)
    assert out.shape == (B, 1, H, W), out.shape
    assert jnp.allclose(out, ref, atol=1e-5, rtol=1e-5), float(
        jnp.max(jnp.abs(out - ref))
    )

    print("KERNEL_OK")
</pallas_src>

<mosaic_0001>
module attributes {stable_mosaic.version = 11 : i64} {
  func.func @kernel(%arg0: i32, %arg1: i32, %arg2: i32, %arg3: memref<1x4x128xf32, #tpu.memory_space<vmem>>, %arg4: memref<1x1x128xf32, #tpu.memory_space<vmem>>, %arg5: memref<4x128xf32, #tpu.memory_space<vmem>>) attributes {dimension_semantics = [#tpu.dimension_semantics<parallel>, #tpu.dimension_semantics<parallel>, #tpu.dimension_semantics<arbitrary>], iteration_bounds = array<i64: 2, 2, 1>, scalar_prefetch = 0 : i64, scratch_operands = 1 : i64, tpu.core_type = #tpu.core_type<tc>, window_params = [{transform_indices = @transform_0, window_bounds = array<i64: 1, 4, 128>}, {transform_indices = @transform_1, window_bounds = array<i64: 1, 1, 128>}]} {
    %cst = arith.constant 0.000000e+00 : f32
    %0 = vector.broadcast %cst : f32 to vector<4x128xf32>
    %c0 = arith.constant 0 : index
    %c0_0 = arith.constant 0 : index
    %c0_1 = arith.constant 0 : index
    %1 = vector.load %arg3[%c0, %c0_0, %c0_1] : memref<1x4x128xf32, #tpu.memory_space<vmem>>, vector<1x4x128xf32>
    %2 = vector.shape_cast %1 : vector<1x4x128xf32> to vector<4x128xf32>
    %3 = arith.addf %0, %2 : vector<4x128xf32>
    %cst_2 = arith.constant dense<0.000000e+00> : vector<128xf32>
    %4 = vector.multi_reduction <add>, %3, %cst_2 [0] : vector<4x128xf32> to vector<128xf32>
    %5 = vector.shape_cast %4 : vector<128xf32> to vector<1x128xf32>
    %cst_3 = arith.constant 2.500000e-01 : f32
    %6 = vector.broadcast %cst_3 : f32 to vector<1x128xf32>
    %7 = arith.mulf %5, %6 : vector<1x128xf32>
    %c0_4 = arith.constant 0 : index
    %c0_5 = arith.constant 0 : index
    %c0_6 = arith.constant 0 : index
    %8 = vector.load %arg4[%c0_4, %c0_5, %c0_6] : memref<1x1x128xf32, #tpu.memory_space<vmem>>, vector<1x1x128xf32>
    %9 = vector.shape_cast %8 : vector<1x1x128xf32> to vector<1x128xf32>
    %10 = vector.shape_cast %7 : vector<1x128xf32> to vector<1x1x128xf32>
    tpu.vector_store %arg4[%c0_4, %c0_5, %c0_6], %10 {strides = array<i32>} : memref<1x1x128xf32, #tpu.memory_space<vmem>>, vector<1x1x128xf32>,
    return
  }
  func.func @transform_0(%arg0: i32, %arg1: i32, %arg2: i32) -> (i32, i32, i32) {
    %c0_i32 = arith.constant 0 : i32
    return %arg0, %arg2, %arg1 : i32, i32, i32
  }
  func.func @transform_1(%arg0: i32, %arg1: i32, %arg2: i32) -> (i32, i32, i32) {
    %c0_i32 = arith.constant 0 : i32
    %c0_i32_0 = arith.constant 0 : i32
    return %arg0, %c0_i32, %arg1 : i32, i32, i32
  }
}

</mosaic_0001>

<bundles_post_ra>
// kernel: tpu_custom_call.1
= control target key start
LH: loop header
LB: loop body
LE: loop exit
PB: predicated region body
PF: predicated region fallthrough
CT: control target
= control target key end

     0   :  { %6 = vsyncpa [#allocation4], 0  ;;  %s698_s0 = inlined_call_operand.hbm [shape: f32[2,4,256], index: 0, kind: input, shape index: {}]   ;;  %s699_s1 = inlined_call_operand.hbm [shape: f32[2,1,256], index: 1, kind: output, shape index: {}]  }
   0x1   :  { %8 = vsyncpa [#allocation4 + $0x1], 0 }
   0x2   :  { %9 = vsyncpa [#allocation5], 0 }
   0x3   :  { %11 = vsyncpa [#allocation5 + $0x1], 0  ;;  %s503_s6 = smov 0   ;;  %s505_s7 = smov 0  }
   0x4   :  { %s507_s8 = smov 0   ;;  %s509_s9 = smov 0  }
   0x5   :  { %s511_s10 = smov 0   ;;  %s513_s11 = smov 0  }
   0x6   :  { %s515_s12 = smov 0   ;;  %s517_s13 = smov 0  }
   0x7 LB: > { %s270_s14 = sadd.s32 4294967295, %s489_s13   ;;  %s271_s15 = sadd.s32 4294967294, %s489_s13   ;;  %s489_s13 = sphi %s517_s13, %s17_s13   ;;  %s485_s12 = sphi %s515_s12, %s716_s12   ;;  %s481_s11 = sphi %s513_s11, %s715_s11   ;;  %s477_s10 = sphi %s511_s10, %s714_s10   ;;  %s473_s9 = sphi %s509_s9, %s713_s9   ;;  %s469_s8 = sphi %s507_s8, %s712_s8   ;;  %s465_s7 = sphi %s505_s7, %s711_s7   ;;  %s461_s6 = sphi %s503_s6, %s710_s6  }
   0x8   : > { %s32_s16 = sadd.s32 1, %s481_s11  ;;  %s36_s17 = sadd.s32 1, %s485_s12 }
   0x9   : > { %p34_p0 = scmp.ge.s32.totalorder %s32_s16, 2  ;;  %s47_s18 = sadd.s32 1, %s469_s8 }
   0xa   : > { %p54_p1 = scmp.ne.s32.totalorder %s469_s8, %s465_s7  ;;  %p55_p2 = scmp.eq.s32.totalorder %s489_s13, 0 }
   0xb   : > { %s718_s16 = smov (%p34_p0, %s32_s16), 0  ;;  %s720_s17 = smov (!%p34_p0, %s36_s17), %s485_s12 }
   0xc   : > { %s43_s19 = ssub.s32 %s481_s11, %s718_s16  ;;  %p556_p3 = por %p55_p2, %p54_p1 }
   0xd   : > { %p38_p4 = scmp.ge.s32.totalorder %s720_s17, 2  ;;  %p60_p5 = scmp.ne.s32.totalorder %s465_s7, %s461_s6 }
   0xe   : > { %p61_p6 = scmp.eq.s32.totalorder %s270_s14, 0  ;;  %p86_p7 = scmp.eq.s32.totalorder %s270_s14, 3 }
   0xf   : > { %s722_s17 = smov (%p38_p4, %s720_s17), 0  ;;  %p92_p10 = scmp.eq.s32.totalorder %s271_s15, 3 }
  0x10   : > { %p564_p8 = por %p61_p6, %p60_p5  ;;  %p568_p9 = por %p86_p7, %p54_p1 }
  0x11   : > { %s40_s23 = ssub.s32 %s485_s12, %s722_s17  ;;  %p574_p12 = por %p92_p10, %p60_p5 }
  0x12   : > { %s703_s22 = scalar_select %p568_p9, 1, 0 }
  0x13   : > { %s44_s24 = sor.u32 %s43_s19, %s40_s23  ;;  %p295_p13 = scmp.lt.s32.totalorder %s489_s13, 4 }
  0x14   : > { %p45_p11 = scmp.eq.s32.totalorder %s44_s24, 0  ;;  %s112_s26 = sand.u32 1, %s469_s8  }
  0x15   : > { %s704_s25 = scalar_select %p574_p12, 1, 0 }
  0x16   : > { %s581_s27 = scalar_select %p45_p11, %s469_s8, %s47_s18  }
  0x17   : > { %s274_s28 = sshll.u32 %s112_s26, 2  ;;  %s275_s29 = sshll.u32 %s485_s12, 1 }
  0x18   : > { %s123_s30 = sadd.s32 %s481_s11, %s275_s29  ;;  %s116_s2 = scalar_lea.vmem [#allocation3], %s274_s28 }
  0x19   : > { %s127_s3 = sshll.u32 %s116_s2, 4  ;;  %s276_s4 = sshll.u32 %s123_s30, 6  ;;  %s585_s3 = int_to_ptr.vmem [resolvable:$true] %s127_s3 }
  0x1a   : > { %s590_s15 = scalar_lea.hbm %s698_s0, %s276_s4  ;;  %p594_p0 = pnand %p295_p13, %p556_p3 }
  0x1b   : > { %s113_s19 = scalar_lea.sflag [#allocation4], %s112_s26  ;;  %s361_s23 = scalar_lea.hbm %s590_s15, 64 }
  0x1c   : > { %p362_p4 = scmp.ne.s32.totalorder %s590_s15, %s361_s23  ;;  %p363_p5 = pneg %p594_p0 }
  0x1d   : > { %s366_s28 = scalar_lea.hbm %s698_s0, 256  ;;  %p367_p3 = scmp.lt.u32.totalorder %s590_s15, %s698_s0 }
  0x1e   : > { %p364_p6 = pnand %p363_p5, %p362_p4  ;;  %p368_p10 = scmp.lt.u32.totalorder %s366_s28, %s361_s23 }
  0x1f   : > { %p370_p13 = scmp.lt.u32.totalorder %s361_s23, %s590_s15 }
  0x20   : > { %p365_p7 = pneg %p364_p6  ;;  %p369_p11 = por %p368_p10, %p367_p3 }
  0x22   : > { %p371_p1 = por %p370_p13, %p369_p11 }
  0x24   : > { %p372_p2 = pnand %p371_p1, %p365_p7 }
  0x26   : > { %375 = shalt.err (!%p372_p2)
}
  0x27   : > { %s376_s26 = scalar_lea.vmem %s585_s3, 64  ;;  %s491_s2 = smov [#allocation3]  }
  0x28   : > { %p377_p4 = scmp.ne.s32.totalorder %s585_s3, %s376_s26  ;;  %s381_s4 = sshll.u32 %s491_s2, 4  ;;  %s382_s4 = int_to_ptr.vmem [resolvable:$false] %s381_s4 }
  0x29   : > { %s383_s5 = scalar_lea.vmem %s382_s4, 128  ;;  %p384_p9 = scmp.lt.s32.totalorder %s585_s3, %s382_s4 }
  0x2a   : > { %p379_p6 = pnand %p377_p4, %p363_p5  ;;  %p385_p3 = scmp.lt.s32.totalorder %s383_s5, %s376_s26 }
  0x2c   : > { %p380_p12 = pneg %p379_p6  ;;  %p386_p10 = por %p385_p3, %p384_p9 }
  0x2e   : > { %p387_p11 = pnand %p386_p10, %p380_p12 }
  0x30   : > { %390 = shalt.err (!%p387_p11)
}
  0x31   : > { %290 = dma.hbm_to_vmem [thread:$0]  (!%p594_p0), %s590_s15, 64, %s585_s3, %s113_s19  }
  0x32   : > { %p706_p1 = scmp.lt.s32.totalorder %s489_s13, 5  ;;  %p707_p2 = scmp.ge.s32.totalorder %s489_s13, 1 }
  0x34   : > { %p133_p5 = pnand %p707_p2, %p706_p1 }
  0x35   : > { %s630_s14 = sand.u32 (!%p133_p5), 1, %s465_s7  }
  0x36   : > { %136 = sbr.rel (%p133_p5) target bundleno = 92 (0x5c), region = 24  ;;  %s278_s23 = sshll.u32 (!%p133_p5), %s630_s14, 2 }
  0x37   : > { %s139_s20 = scalar_lea.sflag (!%p133_p5), [#allocation4], %s630_s14  ;;  %s142_s24 = scalar_lea.vmem (!%p133_p5), [#allocation3], %s278_s23 }
  0x3d   : > { %452 = dma.done.wait (%p564_p8), %s139_s20, 64  }
  0x3e   : > { %454 = vsyncadd (%p564_p8), %s139_s20, 4294967232  ;;  %vm162_vm0 = vcmask 1043456   ;;  %v160_v0 = vld [vmem:[%s142_s24] sm:$0xf]  ;;  %s279_s3 = sshll.u32 %s477_s10, 1  ;;  %s159_s18 = scalar_lea.vmem [#allocation6], %s630_s14 }
  0x3f   : > { %v163_v1 = vsel %vm162_vm0, %v160_v0, 0.0  ;;  %s183_s15 = sadd.s32 %s473_s9, %s279_s3  ;;  %s187_s19 = sshll.u32 %s159_s18, 4  ;;  %s641_s19 = int_to_ptr.vmem [resolvable:$true] %s187_s19 }
  0x40   : > { %v164_v2 = vrot.slane %v163_v1, 4  ;;  %s280_s28 = sshll.u32 %s183_s15, 4  ;;  %s173_s10 = scalar_lea.sflag [#allocation5], %s630_s14 }
  0x41   : > { %s646_s30 = scalar_lea.hbm %s699_s1, %s280_s28  ;;  %s391_s26 = scalar_lea.vmem %s641_s19, 16 }
  0x42   : > { %v165_v3 = vadd.f32 %v164_v2, %v163_v1  ;;  %p392_p8 = scmp.ne.s32.totalorder %s641_s19, %s391_s26  ;;  %p708_p9 = scmp.ne.s32.totalorder %s703_s22, 0 }
  0x43   : > { %s492_s9 = smov [#allocation6]  }
  0x44   : > { %v166_v4 = vrot.slane %v165_v3, 2  ;;  %p393_p12 = pnand %p392_p8, %p708_p9  ;;  %s395_s2 = sshll.u32 %s492_s9, 4  ;;  %s396_s2 = int_to_ptr.vmem [resolvable:$false] %s395_s2 }
  0x45   : > { %s397_s4 = scalar_lea.vmem %s396_s2, 32  ;;  %p398_p7 = scmp.lt.s32.totalorder %s641_s19, %s396_s2 }
  0x46   : > { %v167_v5 = vadd.f32 %v166_v4, %v165_v3  ;;  %p394_p0 = pneg %p393_p12  ;;  %p399_p13 = scmp.lt.s32.totalorder %s397_s4, %s391_s26 }
  0x48   : > { %v168_v6 = vrot.slane %v167_v5, 1  ;;  %p400_p4 = por %p399_p13, %p398_p7 }
  0x4a   : > { %v169_v7 = vadd.f32 %v168_v6, %v167_v5  ;;  %p401_p6 = pnand %p400_p4, %p394_p0 }
  0x4c   : > { %v170_v8 = vmul.f32 0.25, %v169_v7 }
  0x4e   : > { %171 = vst [vmem:[%s159_s18] sm:$0x1] %v170_v8 }
  0x4f   : > { %404 = shalt.err (!%p401_p6)
}
  0x50   : > { %s405_s5 = scalar_lea.hbm %s646_s30, 16  ;;  %s409_s20 = scalar_lea.hbm %s699_s1, 64 }
  0x51   : > { %p406_p3 = scmp.ne.s32.totalorder %s646_s30, %s405_s5  ;;  %p410_p1 = scmp.lt.u32.totalorder %s646_s30, %s699_s1 }
  0x52   : > { %p411_p2 = scmp.lt.u32.totalorder %s409_s20, %s405_s5  ;;  %p413_p8 = scmp.lt.u32.totalorder %s405_s5, %s646_s30 }
  0x53   : > { %p407_p10 = pnand %p406_p3, %p708_p9 }
  0x54   : > { %p412_p5 = por %p411_p2, %p410_p1 }
  0x55   : > { %p408_p11 = pneg %p407_p10 }
  0x56   : > { %p414_p12 = por %p413_p8, %p412_p5 }
  0x58   : > { %p415_p0 = pnand %p414_p12, %p408_p11 }
  0x5a   : > { %418 = shalt.err (!%p415_p0)
}
  0x5b   : > { %285 = dma.vmem_to_hbm [thread:$0]  (%p708_p9), %s641_s19, 16, %s646_s30, %s173_s10  }
  0x5c PF: > { %p296_p7 = scmp.ge.s32.totalorder %s489_s13, 2  ;;  %s199_s15 = sand.u32 1, %s461_s6  }
  0x5d   : > { %p709_p13 = scmp.ne.s32.totalorder %s704_s25, 0  ;;  %s200_s18 = scalar_lea.sflag [#allocation5], %s199_s15 }
  0x5f   : > { %p292_p4 = pnand %p296_p7, %p709_p13 }
  0x61   : > { %456 = dma.done.wait (!%p292_p4), %s200_s18, 16  }
  0x62   : > { %458 = vsyncadd (!%p292_p4), %s200_s18, 4294967280  ;;  %s17_s13 = sadd.s32 1, %s489_s13   ;;  %s710_s6 = smov %s465_s7 }
  0x63   : > { %p14_p6 = scmp.ge.s32.totalorder %s17_s13, 6   ;;  %s711_s7 = smov %s469_s8 }
  0x64   : > { %s712_s8 = smov %s581_s27  ;;  %s713_s9 = smov %s481_s11 }
  0x65   : > { %s714_s10 = smov %s485_s12  ;;  %s715_s11 = smov %s718_s16 }
  0x66   : > { %s716_s12 = smov %s722_s17  ;;  %16 = sbr.rel (!%p14_p6) target bundleno = 7 (0x7), region = 69 }
  0x6d   :  { %204 = vsyncpa [#allocation4], 1 }
  0x6e   :  { %206 = vsyncpa [#allocation4 + $0x1], 1 }
  0x6f   :  { %207 = vsyncpa [#allocation5], 1 }
  0x70   :  { %209 = vsyncpa [#allocation5 + $0x1], 1 }

</bundles_post_ra>
